<compile_context>
chip_gen: v7x
topology: tpu7x:2x2x1
jax: 0.10.0
libtpu: 0.0.40
codegen_flags: <defaults>
</compile_context>

<pallas_src>
import functools

import jax
import jax.numpy as jnp
from jax.experimental import pallas as pl
from jax.experimental.pallas import tpu as pltpu


def _round_up(n, m):
    return ((n + m - 1) // m) * m


def _mlp_body(x_ref, w1_ref, b1_ref, w2_ref, b2_ref, w3_ref, b3_ref):
    # x streams in its native dtype; cast to the weight compute dtype (bf16)
    # in-kernel (VALU slots are idle -> free). All accumulation is f32 (MXU).
    x = x_ref[...].astype(w1_ref.dtype)
    h1 = jnp.dot(x, w1_ref[...], preferred_element_type=jnp.float32) + b1_ref[...]
    h1 = jnp.maximum(h1, 0.0)
    h2 = jnp.dot(h1.astype(w2_ref.dtype), w2_ref[...],
                 preferred_element_type=jnp.float32) + b2_ref[...]
    h2 = jnp.maximum(h2, 0.0)
    logits = jnp.dot(h2.astype(w3_ref.dtype), w3_ref[...],
                     preferred_element_type=jnp.float32) + b3_ref[...]
    return logits, h2


def _mlp_kernel_logits(x_ref, w1_ref, b1_ref, w2_ref, b2_ref, w3_ref, b3_ref,
                       logits_ref):
    logits, _ = _mlp_body(x_ref, w1_ref, b1_ref, w2_ref, b2_ref, w3_ref, b3_ref)
    logits_ref[...] = logits.astype(logits_ref.dtype)


def _mlp_kernel_with_emb(x_ref, w1_ref, b1_ref, w2_ref, b2_ref, w3_ref, b3_ref,
                         logits_ref, emb_ref):
    logits, h2 = _mlp_body(x_ref, w1_ref, b1_ref, w2_ref, b2_ref, w3_ref, b3_ref)
    logits_ref[...] = logits.astype(logits_ref.dtype)
    emb_ref[...] = h2.astype(emb_ref.dtype)


def simple_mlp_forward(x, params, return_embedding=False, *,
                       tm_max=1024, compute_dtype=jnp.bfloat16,
                       emb_dtype=jnp.bfloat16):
    """x: [B, C, H, W] (or any shape with a leading batch dim); flattened like
    torch's x.view(B, -1). Weights are stored (in_features, out_features)."""
    B = x.shape[0]
    x_flat = x.reshape(B, -1)
    w1, b1, w2, b2, w3, b3 = params
    input_size = w1.shape[0]
    h1_dim = w1.shape[1]
    h2_dim = w2.shape[1]
    num_classes = w3.shape[1]
    assert x_flat.shape[1] == input_size

    # ---- batch tiling (grid over the batch) ----
    # Balanced tile, multiple of 16 (bf16 row-group); >=2 steps when the batch
    # has >=2 row-groups so a 2-TC chip (v7x) can shard the "parallel" axis.
    min_steps = 2 if B >= 32 else 1
    n_steps = max(pl.cdiv(B, tm_max), min_steps)
    tm = _round_up(pl.cdiv(B, n_steps), 16)
    b_pad = n_steps * tm
    grid = (n_steps,)

    # ---- lane-dense logits: pad num_classes up to a multiple of 128 ----
    nc_pad = _round_up(num_classes, 128)

    # ---- weights: bf16 stream; biases stay f32 (tiny, added post-accum) ----
    # NOTE: no astype/pad pass over x — it streams in its native dtype and the
    # batch remainder is a Pallas partial last block (garbage rows sliced off).
    w1c = w1.astype(compute_dtype)
    w2c = w2.astype(compute_dtype)
    w3c = jnp.pad(w3, ((0, 0), (0, nc_pad - num_classes))).astype(compute_dtype)
    b1r = b1.reshape(1, -1).astype(jnp.float32)
    b2r = b2.reshape(1, -1).astype(jnp.float32)
    b3r = jnp.pad(b3, (0, nc_pad - num_classes)).reshape(1, -1).astype(jnp.float32)

    # Weights/biases: constant block index -> VMEM-resident across grid steps.
    resident = lambda shape: pl.BlockSpec(shape, lambda i: (0,) * len(shape))
    # Activations / outputs: stream one (tm, cols) tile per grid step.
    stream = lambda cols: pl.BlockSpec((tm, cols), lambda i: (i, 0))

    in_specs = [
        stream(input_size),
        resident(w1c.shape), resident(b1r.shape),
        resident(w2c.shape), resident(b2r.shape),
        resident(w3c.shape), resident(b3r.shape),
    ]

    emb_itemsize = jnp.dtype(emb_dtype).itemsize
    if return_embedding:
        kernel = _mlp_kernel_with_emb
        out_shape = (jax.ShapeDtypeStruct((b_pad, nc_pad), jnp.float32),
                     jax.ShapeDtypeStruct((b_pad, h2_dim), emb_dtype))
        out_specs = [stream(nc_pad), stream(h2_dim)]
    else:
        kernel = _mlp_kernel_logits
        out_shape = jax.ShapeDtypeStruct((b_pad, nc_pad), jnp.float32)
        out_specs = stream(nc_pad)

    # ---- cost hint for XLA's scheduler ----
    x_itemsize = x_flat.dtype.itemsize
    flops = 2 * b_pad * (input_size * h1_dim + h1_dim * h2_dim + h2_dim * nc_pad)
    weight_bytes = sum(a.size * a.dtype.itemsize
                       for a in (w1c, w2c, w3c, b1r, b2r, b3r))
    bytes_accessed = (
        B * input_size * x_itemsize
        + weight_bytes
        + b_pad * nc_pad * 4
        + (b_pad * h2_dim * emb_itemsize if return_embedding else 0)
    )
    cost = pl.CostEstimate(flops=flops, transcendentals=0,
                           bytes_accessed=bytes_accessed)

    # ---- explicit VMEM budget (>= 32 MiB default, <= v7x 64 MiB physical) ----
    vmem_est = (
        2 * tm * input_size * x_itemsize        # x tile, double-buffered
        + 2 * weight_bytes                       # resident blocks (conservative x2)
        + 2 * tm * nc_pad * 4                    # logits tile, double-buffered
        + (2 * tm * h2_dim * emb_itemsize if return_embedding else 0)
        + 4 * tm * (h1_dim + h2_dim)             # f32 intermediates margin
    )
    vmem_limit = min(64 << 20, max(32 << 20, 2 * vmem_est))

    result = pl.pallas_call(
        kernel,
        out_shape=out_shape,
        grid_spec=pltpu.PrefetchScalarGridSpec(
            num_scalar_prefetch=0,
            grid=grid,
            in_specs=in_specs,
            out_specs=out_specs,
        ),
        compiler_params=pltpu.CompilerParams(
            dimension_semantics=("parallel",),   # megacore: split batch tiles
            vmem_limit_bytes=vmem_limit,
        ),
        cost_estimate=cost,
    )(x_flat, w1c, b1r, w2c, b2r, w3c, b3r)

    # Padded rows (if any) contain undefined data — always slice them off.
    if return_embedding:
        logits_pad, emb_pad = result
        return logits_pad[:B, :num_classes], emb_pad[:B, :]
    return result[:B, :num_classes]


def init_params(key, input_size, num_classes):
    """Deterministic init mimicking nn.Linear (uniform +/- 1/sqrt(fan_in)).
    Weights stored as (in_features, out_features)."""
    def linear(k, fan_in, fan_out):
        kw, kb = jax.random.split(k)
        bound = 1.0 / jnp.sqrt(jnp.float32(fan_in))
        w = jax.random.uniform(kw, (fan_in, fan_out), jnp.float32, -bound, bound)
        b = jax.random.uniform(kb, (fan_out,), jnp.float32, -bound, bound)
        return w, b

    k1, k2, k3 = jax.random.split(key, 3)
    w1, b1 = linear(k1, input_size, 256)
    w2, b2 = linear(k2, 256, 128)
    w3, b3 = linear(k3, 128, num_classes)
    return (w1, b1, w2, b2, w3, b3)


if __name__ == "__main__":
    key = jax.random.PRNGKey(0)
    k_x, k_p = jax.random.split(key)

    # Small example consistent with an image-style input: [B, C, H, W]
    B, C, H, W = 2, 4, 16, 16
    input_size = C * H * W      # 1024
    num_classes = 10

    x = jax.random.normal(k_x, (B, C, H, W), jnp.float32)
    params = init_params(k_p, input_size, num_classes)

    fwd = jax.jit(functools.partial(simple_mlp_forward),
                  static_argnames=("return_embedding",))

    # Kernel: with and without the embedding output.
    logits, emb = fwd(x, params, return_embedding=True)
    logits_only = fwd(x, params, return_embedding=False)
    jax.block_until_ready((logits, emb, logits_only))

    # Reference in plain JAX mirroring the kernel's bf16-compute / f32-accumulate math.
    # NOTE: h1/h2 are rounded to bf16 between layers, so results differ slightly
    # from a pure-f32 torch SimpleMLP (covered by the tolerances below).
    w1, b1, w2, b2, w3, b3 = params
    bf16 = jnp.bfloat16
    xf = x.reshape(B, -1)
    h1 = jnp.maximum(
        jnp.dot(xf.astype(bf16), w1.astype(bf16),
                preferred_element_type=jnp.float32) + b1, 0.0)
    h2 = jnp.maximum(
        jnp.dot(h1.astype(bf16), w2.astype(bf16),
                preferred_element_type=jnp.float32) + b2, 0.0)
    ref_logits = jnp.dot(h2.astype(bf16), w3.astype(bf16),
                         preferred_element_type=jnp.float32) + b3

    assert logits.shape == (B, num_classes)
    assert emb.shape == (B, 128)
    assert logits_only.shape == (B, num_classes)
    assert jnp.allclose(logits, ref_logits, atol=5e-3, rtol=5e-3)
    assert jnp.allclose(logits_only, ref_logits, atol=5e-3, rtol=5e-3)
    # Embedding is emitted in bf16; compare against the bf16-rounded reference.
    assert jnp.allclose(emb.astype(jnp.float32),
                        h2.astype(bf16).astype(jnp.float32),
                        atol=5e-3, rtol=5e-3)

    print("KERNEL_OK")
</pallas_src>

<mosaic_0001>
module attributes {stable_mosaic.version = 11 : i64} {
  func.func @_mlp_kernel_with_emb(%arg0: i32, %arg1: memref<16x1024xf32, #tpu.memory_space<vmem>>, %arg2: memref<1024x256xbf16, #tpu.memory_space<vmem>>, %arg3: memref<1x256xf32, #tpu.memory_space<vmem>>, %arg4: memref<256x128xbf16, #tpu.memory_space<vmem>>, %arg5: memref<1x128xf32, #tpu.memory_space<vmem>>, %arg6: memref<128x128xbf16, #tpu.memory_space<vmem>>, %arg7: memref<1x128xf32, #tpu.memory_space<vmem>>, %arg8: memref<16x128xf32, #tpu.memory_space<vmem>>, %arg9: memref<16x128xbf16, #tpu.memory_space<vmem>>) attributes {dimension_semantics = [#tpu.dimension_semantics<parallel>], iteration_bounds = array<i64: 1>, scalar_prefetch = 0 : i64, scratch_operands = 0 : i64, tpu.core_type = #tpu.core_type<tc>, window_params = [{transform_indices = @transform_0, window_bounds = array<i64: 16, 1024>}, {pipeline_mode = #tpu.pipeline_mode<synchronous>, transform_indices = @transform_1, window_bounds = array<i64: 1024, 256>}, {pipeline_mode = #tpu.pipeline_mode<synchronous>, transform_indices = @transform_2, window_bounds = array<i64: 1, 256>}, {pipeline_mode = #tpu.pipeline_mode<synchronous>, transform_indices = @transform_3, window_bounds = array<i64: 256, 128>}, {pipeline_mode = #tpu.pipeline_mode<synchronous>, transform_indices = @transform_4, window_bounds = array<i64: 1, 128>}, {pipeline_mode = #tpu.pipeline_mode<synchronous>, transform_indices = @transform_5, window_bounds = array<i64: 128, 128>}, {pipeline_mode = #tpu.pipeline_mode<synchronous>, transform_indices = @transform_6, window_bounds = array<i64: 1, 128>}, {transform_indices = @transform_7, window_bounds = array<i64: 16, 128>}, {transform_indices = @transform_8, window_bounds = array<i64: 16, 128>}]} {
    %c0 = arith.constant 0 : index
    %c0_0 = arith.constant 0 : index
    %0 = vector.load %arg1[%c0, %c0_0] : memref<16x1024xf32, #tpu.memory_space<vmem>>, vector<16x1024xf32>
    %1 = arith.truncf %0 : vector<16x1024xf32> to vector<16x1024xbf16>
    %c0_1 = arith.constant 0 : index
    %c0_2 = arith.constant 0 : index
    %2 = vector.load %arg2[%c0_1, %c0_2] : memref<1024x256xbf16, #tpu.memory_space<vmem>>, vector<1024x256xbf16>
    %cst = arith.constant dense<0.000000e+00> : vector<16x256xf32>
    %3 = tpu.matmul %1, %2, %cst {dimension_numbers = #tpu.dot_dimension_numbers<[1], [0], [0], [1], [0, 0, 1, 1], [], []>} : vector<16x1024xbf16>, vector<1024x256xbf16>, vector<16x256xf32> -> vector<16x256xf32>
    %c0_3 = arith.constant 0 : index
    %c0_4 = arith.constant 0 : index
    %4 = vector.load %arg3[%c0_3, %c0_4] : memref<1x256xf32, #tpu.memory_space<vmem>>, vector<1x256xf32>
    %5 = vector.broadcast %4 : vector<1x256xf32> to vector<16x256xf32>
    %6 = arith.addf %3, %5 : vector<16x256xf32>
    %cst_5 = arith.constant 0.000000e+00 : f32
    %7 = vector.broadcast %cst_5 : f32 to vector<16x256xf32>
    %8 = arith.maximumf %6, %7 : vector<16x256xf32>
    %9 = arith.truncf %8 : vector<16x256xf32> to vector<16x256xbf16>
    %c0_6 = arith.constant 0 : index
    %c0_7 = arith.constant 0 : index
    %10 = vector.load %arg4[%c0_6, %c0_7] : memref<256x128xbf16, #tpu.memory_space<vmem>>, vector<256x128xbf16>
    %cst_8 = arith.constant dense<0.000000e+00> : vector<16x128xf32>
    %11 = tpu.matmul %9, %10, %cst_8 {dimension_numbers = #tpu.dot_dimension_numbers<[1], [0], [0], [1], [0, 0, 1, 1], [], []>} : vector<16x256xbf16>, vector<256x128xbf16>, vector<16x128xf32> -> vector<16x128xf32>
    %c0_9 = arith.constant 0 : index
    %c0_10 = arith.constant 0 : index
    %12 = vector.load %arg5[%c0_9, %c0_10] : memref<1x128xf32, #tpu.memory_space<vmem>>, vector<1x128xf32>
    %13 = vector.broadcast %12 : vector<1x128xf32> to vector<16x128xf32>
    %14 = arith.addf %11, %13 : vector<16x128xf32>
    %cst_11 = arith.constant 0.000000e+00 : f32
    %15 = vector.broadcast %cst_11 : f32 to vector<16x128xf32>
    %16 = arith.maximumf %14, %15 : vector<16x128xf32>
    %17 = arith.truncf %16 : vector<16x128xf32> to vector<16x128xbf16>
    %c0_12 = arith.constant 0 : index
    %c0_13 = arith.constant 0 : index
    %18 = vector.load %arg6[%c0_12, %c0_13] : memref<128x128xbf16, #tpu.memory_space<vmem>>, vector<128x128xbf16>
    %cst_14 = arith.constant dense<0.000000e+00> : vector<16x128xf32>
    %19 = tpu.matmul %17, %18, %cst_14 {dimension_numbers = #tpu.dot_dimension_numbers<[1], [0], [0], [1], [0, 0, 1, 1], [], []>} : vector<16x128xbf16>, vector<128x128xbf16>, vector<16x128xf32> -> vector<16x128xf32>
    %c0_15 = arith.constant 0 : index
    %c0_16 = arith.constant 0 : index
    %20 = vector.load %arg7[%c0_15, %c0_16] : memref<1x128xf32, #tpu.memory_space<vmem>>, vector<1x128xf32>
    %21 = vector.broadcast %20 : vector<1x128xf32> to vector<16x128xf32>
    %22 = arith.addf %19, %21 : vector<16x128xf32>
    %c0_17 = arith.constant 0 : index
    %c0_18 = arith.constant 0 : index
    %23 = vector.load %arg8[%c0_17, %c0_18] : memref<16x128xf32, #tpu.memory_space<vmem>>, vector<16x128xf32>
    tpu.vector_store %arg8[%c0_17, %c0_18], %22 {strides = array<i32>} : memref<16x128xf32, #tpu.memory_space<vmem>>, vector<16x128xf32>,
    %24 = arith.truncf %16 : vector<16x128xf32> to vector<16x128xbf16>
    %c0_19 = arith.constant 0 : index
    %c0_20 = arith.constant 0 : index
    %25 = vector.load %arg9[%c0_19, %c0_20] : memref<16x128xbf16, #tpu.memory_space<vmem>>, vector<16x128xbf16>
    tpu.vector_store %arg9[%c0_19, %c0_20], %24 {strides = array<i32>} : memref<16x128xbf16, #tpu.memory_space<vmem>>, vector<16x128xbf16>,
    return
  }
  func.func @transform_0(%arg0: i32) -> (i32, i32) {
    %c0_i32 = arith.constant 0 : i32
    %c0_i32_0 = arith.constant 0 : i32
    return %arg0, %c0_i32 : i32, i32
  }
  func.func @transform_1(%arg0: i32) -> (i32, i32) {
    %c0_i32 = arith.constant 0 : i32
    %c0_i32_0 = arith.constant 0 : i32
    %c0_i32_1 = arith.constant 0 : i32
    return %c0_i32, %c0_i32_0 : i32, i32
  }
  func.func @transform_2(%arg0: i32) -> (i32, i32) {
    %c0_i32 = arith.constant 0 : i32
    %c0_i32_0 = arith.constant 0 : i32
    %c0_i32_1 = arith.constant 0 : i32
    return %c0_i32, %c0_i32_0 : i32, i32
  }
  func.func @transform_3(%arg0: i32) -> (i32, i32) {
    %c0_i32 = arith.constant 0 : i32
    %c0_i32_0 = arith.constant 0 : i32
    %c0_i32_1 = arith.constant 0 : i32
    return %c0_i32, %c0_i32_0 : i32, i32
  }
  func.func @transform_4(%arg0: i32) -> (i32, i32) {
    %c0_i32 = arith.constant 0 : i32
    %c0_i32_0 = arith.constant 0 : i32
    %c0_i32_1 = arith.constant 0 : i32
    return %c0_i32, %c0_i32_0 : i32, i32
  }
  func.func @transform_5(%arg0: i32) -> (i32, i32) {
    %c0_i32 = arith.constant 0 : i32
    %c0_i32_0 = arith.constant 0 : i32
    %c0_i32_1 = arith.constant 0 : i32
    return %c0_i32, %c0_i32_0 : i32, i32
  }
  func.func @transform_6(%arg0: i32) -> (i32, i32) {
    %c0_i32 = arith.constant 0 : i32
    %c0_i32_0 = arith.constant 0 : i32
    %c0_i32_1 = arith.constant 0 : i32
    return %c0_i32, %c0_i32_0 : i32, i32
  }
  func.func @transform_7(%arg0: i32) -> (i32, i32) {
    %c0_i32 = arith.constant 0 : i32
    %c0_i32_0 = arith.constant 0 : i32
    return %arg0, %c0_i32 : i32, i32
  }
  func.func @transform_8(%arg0: i32) -> (i32, i32) {
    %c0_i32 = arith.constant 0 : i32
    %c0_i32_0 = arith.constant 0 : i32
    return %arg0, %c0_i32 : i32, i32
  }
}

</mosaic_0001>

<bundles_post_ra>
// kernel: simple_mlp_forward.1
= control target key start
LH: loop header
LB: loop body
LE: loop exit
PB: predicated region body
PF: predicated region fallthrough
CT: control target
= control target key end

     0   :  { %v1970_v9 = vmov 1983009808   ;;  %v68_v11 = vlaneseq  ;;  %vm1972_vm0 = vmmov 0   ;;  %s2601_s1 = inlined_call_operand.vmem [shape: bf16[1024,256], index: 1, kind: input, shape index: {}]   ;;  %s2602_s0 = inlined_call_operand.vmem [shape: f32[2,1024], index: 0, kind: input, shape index: {}]   ;;  %s2603_s3 = inlined_call_operand.vmem [shape: bf16[256,128], index: 3, kind: input, shape index: {}]   ;;  %s2604_s5 = inlined_call_operand.vmem [shape: bf16[128,128], index: 5, kind: input, shape index: {}]   ;;  %s2605_s2 = inlined_call_operand.vmem [shape: f32[1,256], index: 2, kind: input, shape index: {}]   ;;  %s2606_s4 = inlined_call_operand.vmem [shape: f32[1,128], index: 4, kind: input, shape index: {}]   ;;  %s2607_s8 = inlined_call_operand.vmem [shape: bf16[16,128], index: 8, kind: output, shape index: {1}]   ;;  %s2608_s6 = inlined_call_operand.vmem [shape: f32[1,128], index: 6, kind: input, shape index: {}]   ;;  %s2609_s7 = inlined_call_operand.vmem [shape: f32[16,128], index: 7, kind: output, shape index: {0}]  }
   0x1   :  { %v1730_v0 = vld [vmem:[%s2601_s1 + $0x104] ss:$8 sps:$4 sm:$0xff]   ;;  %v1732_v1 = vld [vmem:[%s2601_s1 + $0x100] ss:$8 sps:$4 sm:$0xff]   ;;  %v1733_v2 = vld [vmem:[%s2601_s1 + $0x114] ss:$8 sps:$4 sm:$0xff]   ;;  %v66_v10 = vunpack.c.l.s4 %v1970_v9 }
   0x2   :  { %1052 = vmatprep.subr.bf16.mxu0 %v1730_v0  ;;  %v1735_v3 = vld [vmem:[%s2601_s1 + $0x110] ss:$8 sps:$4 sm:$0xff]   ;;  %v1736_v4 = vld [vmem:[%s2601_s1 + $0x124] ss:$8 sps:$4 sm:$0xff]   ;;  %v1738_v5 = vld [vmem:[%s2601_s1 + $0x120] ss:$8 sps:$4 sm:$0xff]  }
   0x3   :  { %1053 = vmatpush1.bf16.msra.mxu0 %v1732_v1  ;;  %v1739_v6 = vld [vmem:[%s2601_s1 + $0x134] ss:$8 sps:$4 sm:$0xff]   ;;  %v1741_v7 = vld [vmem:[%s2601_s1 + $0x130] ss:$8 sps:$4 sm:$0xff]   ;;  %v1742_v8 = vld [vmem:[%s2601_s1 + $0x144] ss:$8 sps:$4 sm:$0xff]   ;;  %v67_v14 = vunpack.c.0.s8 %v66_v10 }
   0x4   :  { %1054 = vmatprep.subr.bf16.mxu0 %v1733_v2  ;;  %v1744_v12 = vld [vmem:[%s2601_s1 + $0x140] ss:$8 sps:$4 sm:$0xff]   ;;  %v1745_v13 = vld [vmem:[%s2601_s1 + $0x154] ss:$8 sps:$4 sm:$0xff]   ;;  %v2051_v15 = vshrl.u32 %v68_v11, 7 }
   0x5   :  { %v1747_v16 = vld [vmem:[%s2601_s1 + $0x150] ss:$8 sps:$4 sm:$0xff]   ;;  %v1748_v17 = vld [vmem:[%s2601_s1 + $0x164] ss:$8 sps:$4 sm:$0xff]   ;;  %v1750_v18 = vld [vmem:[%s2601_s1 + $0x160] ss:$8 sps:$4 sm:$0xff]  }
   0x6   :  { %v1751_v19 = vld [vmem:[%s2601_s1 + $0x174] ss:$8 sps:$4 sm:$0xff]   ;;  %v2066_v20 = vsub.s32 %v67_v14, %v2051_v15  ;;  %v1753_v28 = vld [vmem:[%s2601_s1 + $0x170] ss:$8 sps:$4 sm:$0xff]   ;;  %v1754_v30 = vld [vmem:[%s2601_s1 + $0x184] ss:$8 sps:$4 sm:$0xff]  }
   0x7   :  { %1055 = vmatpush1.bf16.msra.mxu0 %v1735_v3  ;;  %v1778_v21 = vld [vmem:[%s2602_s0 + $0x4] ss:$16 sps:$4 sm:$0xff]   ;;  %v1756_v33 = vld [vmem:[%s2601_s1 + $0x180] ss:$8 sps:$4 sm:$0xff]   ;;  %v1759_v36 = vld [vmem:[%s2601_s1 + $0x190] ss:$8 sps:$4 sm:$0xff]  }
   0x8   :  { %1056 = vmatprep.subr.bf16.mxu0 %v1736_v4  ;;  %v1780_v22 = vld [vmem:[%s2602_s0 + $0x24] ss:$16 sps:$4 sm:$0xff]   ;;  %v2081_v25 = vrot.slane %v1778_v21, %v2066_v20  ;;  %v1762_v38 = vld [vmem:[%s2601_s1 + $0x1a0] ss:$8 sps:$4 sm:$0xff]   ;;  %v1765_v40 = vld [vmem:[%s2601_s1 + $0x1b0] ss:$8 sps:$4 sm:$0xff]  }
   0x9   :  { %v1782_v23 = vld [vmem:[%s2602_s0 + $0x44] ss:$16 sps:$4 sm:$0xff]   ;;  %v2084_v26 = vrot.slane %v1780_v22, %v2066_v20  ;;  %v1833_v43 = vld [vmem:[%s2601_s1] ss:$8 sps:$4 sm:$0xff]   ;;  %v1771_v47 = vld [vmem:[%s2601_s1 + $0x1d0] ss:$8 sps:$4 sm:$0xff]  }
   0xa   :  { %v1784_v24 = vld [vmem:[%s2602_s0 + $0x64] ss:$16 sps:$4 sm:$0xff]   ;;  %v2087_v27 = vrot.slane %v1782_v23, %v2066_v20  ;;  %v1768_v44 = vld [vmem:[%s2601_s1 + $0x1c0] ss:$8 sps:$4 sm:$0xff]   ;;  %v1839_v48 = vld [vmem:[%s2601_s1 + $0x10] ss:$8 sps:$4 sm:$0xff]  }
   0xb   :  { %1057 = vmatpush1.bf16.msra.mxu0 %v1738_v5  ;;  %v2093_v29 = vrot.slane %v1784_v24, %v2066_v20  ;;  %v96_v31 = vcombine.high %v2081_v25, %v2084_v26  ;;  %v1757_v35 = vld [vmem:[%s2601_s1 + $0x194] ss:$8 sps:$4 sm:$0xff]   ;;  %v1760_v37 = vld [vmem:[%s2601_s1 + $0x1a4] ss:$8 sps:$4 sm:$0xff]   ;;  %v1840_v50 = vld [vmem:[%s2602_s0 + $0x8] ss:$16 sps:$4 sm:$0xff]   ;;  %v95_v0 = vcombine.low %v2081_v25, %v2084_v26 }
   0xc   :  { %1058 = vmatprep.subr.bf16.mxu0 %v1739_v6  ;;  %v1763_v39 = vld [vmem:[%s2601_s1 + $0x1b4] ss:$8 sps:$4 sm:$0xff]   ;;  %v1766_v41 = vld [vmem:[%s2601_s1 + $0x1c4] ss:$8 sps:$4 sm:$0xff]   ;;  %v1842_v51 = vld [vmem:[%s2602_s0 + $0x28] ss:$16 sps:$4 sm:$0xff]   ;;  %v107_v55 = vrot.slane %v1840_v50, %v2066_v20 }
   0xd   :  { %v168_v32 = vcombine.high %v2087_v27, %v2093_v29  ;;  %v1831_v42 = vld [vmem:[%s2601_s1 + $0x4] ss:$8 sps:$4 sm:$0xff]   ;;  %v1769_v45 = vld [vmem:[%s2601_s1 + $0x1d4] ss:$8 sps:$4 sm:$0xff]   ;;  %v1844_v52 = vld [vmem:[%s2602_s0 + $0x48] ss:$16 sps:$4 sm:$0xff]   ;;  %v121_v56 = vrot.slane %v1842_v51, %v2066_v20  ;;  %v167_v1 = vcombine.low %v2087_v27, %v2093_v29 }
   0xe   :  { %1009 = vmatprep.subr.bf16.mxu1 %v1831_v42  ;;  %v1837_v46 = vld [vmem:[%s2601_s1 + $0x14] ss:$8 sps:$4 sm:$0xff]   ;;  %v1772_v49 = vld [vmem:[%s2601_s1 + $0x1e4] ss:$8 sps:$4 sm:$0xff]   ;;  %v1846_v53 = vld [vmem:[%s2602_s0 + $0x68] ss:$16 sps:$4 sm:$0xff]   ;;  %v179_v57 = vrot.slane %v1844_v52, %v2066_v20 }
   0xf   :  { %1059 = vmatpush1.bf16.msra.mxu0 %v1741_v7  ;;  %v224_v34 = vpack.c.bf16 %v168_v32, %v96_v31  ;;  %1010 = vmatpush1.bf16.msra.mxu1 %v1833_v43  ;;  %v1774_v54 = vld [vmem:[%s2601_s1 + $0x1e0] ss:$8 sps:$4 sm:$0xff]   ;;  %v193_v58 = vrot.slane %v1846_v53, %v2066_v20  ;;  %v1851_v59 = vld [vmem:[%s2601_s1 + $0x24] ss:$8 sps:$4 sm:$0xff]   ;;  %v1775_v61 = vld [vmem:[%s2601_s1 + $0x1f4] ss:$8 sps:$4 sm:$0xff]   ;;  %v129_v62 = vcombine.low %v107_v55, %v121_v56 }
  0x10   :  { %1060 = vmatprep.subr.bf16.mxu0 %v1742_v8  ;;  %1011 = vmatprep.subr.bf16.mxu1 %v1837_v46  ;;  %v1853_v60 = vld [vmem:[%s2601_s1 + $0x20] ss:$8 sps:$4 sm:$0xff]   ;;  %v1857_v2 = vld [vmem:[%s2601_s1 + $0x34] ss:$8 sps:$4 sm:$0xff]   ;;  %v1859_v3 = vld [vmem:[%s2601_s1 + $0x30] ss:$8 sps:$4 sm:$0xff]   ;;  %v130_v6 = vcombine.high %v107_v55, %v121_v56  ;;  %v223_v10 = vpack.c.bf16 %v167_v1, %v95_v0 }
  0x11   :  { %1084 = vmatprep.mubr.bf16.mxu0 %v224_v34  ;;  %v201_v63 = vcombine.low %v179_v57, %v193_v58  ;;  %v1777_v4 = vld [vmem:[%s2601_s1 + $0x1f0] ss:$8 sps:$4 sm:$0xff]   ;;  %v1788_v5 = vld [vmem:[%s2601_s1 + $0x204] ss:$8 sps:$4 sm:$0xff]   ;;  %v202_v7 = vcombine.high %v179_v57, %v193_v58  ;;  %v1865_v11 = vld [vmem:[%s2601_s1 + $0x40] ss:$8 sps:$4 sm:$0xff]  }
  0x12   :  { %v1863_v9 = vld [vmem:[%s2601_s1 + $0x44] ss:$8 sps:$4 sm:$0xff]   ;;  %v1877_v22 = vld [vmem:[%s2601_s1 + $0x60] ss:$8 sps:$4 sm:$0xff]   ;;  %v1881_v24 = vld [vmem:[%s2601_s1 + $0x74] ss:$8 sps:$4 sm:$0xff]  }
  0x13   :  { %1061 = vmatpush1.bf16.msra.mxu0 %v1744_v12  ;;  %1012 = vmatpush1.bf16.msra.mxu1 %v1839_v48  ;;  %v2194_v8 = vpack.c.bf16 %v201_v63, %v129_v62  ;;  %v1786_v12 = vld [vmem:[%s2601_s1 + $0x200] ss:$8 sps:$4 sm:$0xff]   ;;  %v226_v14 = vpack.c.bf16 %v202_v7, %v130_v6  ;;  %v1794_v21 = vld [vmem:[%s2601_s1 + $0x224] ss:$8 sps:$4 sm:$0xff]   ;;  %v1797_v25 = vld [vmem:[%s2601_s1 + $0x234] ss:$8 sps:$4 sm:$0xff]  }
  0x14   :  { %1062 = vmatprep.subr.bf16.mxu0 %v1745_v13  ;;  %1013 = vmatprep.subr.bf16.mxu1 %v1851_v59  ;;  %v1791_v13 = vld [vmem:[%s2601_s1 + $0x214] ss:$8 sps:$4 sm:$0xff]   ;;  %v1792_v23 = vld [vmem:[%s2601_s1 + $0x220] ss:$8 sps:$4 sm:$0xff]   ;;  %v1883_v26 = vld [vmem:[%s2601_s1 + $0x70] ss:$8 sps:$4 sm:$0xff]  }
  0x15   :  { %v1795_v27 = vld [vmem:[%s2601_s1 + $0x230] ss:$8 sps:$4 sm:$0xff]   ;;  %v1800_v29 = vld [vmem:[%s2601_s1 + $0x244] ss:$8 sps:$4 sm:$0xff]   ;;  %v1798_v31 = vld [vmem:[%s2601_s1 + $0x240] ss:$8 sps:$4 sm:$0xff]  }
  0x16   :  { %v1893_v32 = vld [vmem:[%s2601_s1 + $0x94] ss:$8 sps:$4 sm:$0xff]   ;;  %v1895_v34 = vld [vmem:[%s2601_s1 + $0x90] ss:$8 sps:$4 sm:$0xff]   ;;  %v1913_v51 = vld [vmem:[%s2601_s1 + $0xc0] ss:$8 sps:$4 sm:$0xff]  }
  0x17   :  { %1063 = vmatpush1.bf16.msra.mxu0 %v1747_v16  ;;  %1014 = vmatpush1.bf16.msra.mxu1 %v1853_v60  ;;  %v1869_v16 = vld [vmem:[%s2601_s1 + $0x54] ss:$8 sps:$4 sm:$0xff]   ;;  %v1807_v42 = vld [vmem:[%s2601_s1 + $0x270] ss:$8 sps:$4 sm:$0xff]   ;;  %v1923_v6 = vld [vmem:[%s2601_s1 + $0xe4] ss:$8 sps:$4 sm:$0xff]  }
  0x18   :  { %1064 = vmatprep.subr.bf16.mxu0 %v1748_v17  ;;  %1015 = vmatprep.subr.bf16.mxu1 %v1857_v2  ;;  %v1871_v17 = vld [vmem:[%s2601_s1 + $0x50] ss:$8 sps:$4 sm:$0xff]   ;;  %v1917_v52 = vld [vmem:[%s2601_s1 + $0xd4] ss:$8 sps:$4 sm:$0xff]  }
  0x19   :  { %v1907_v43 = vld [vmem:[%s2601_s1 + $0xb0] ss:$8 sps:$4 sm:$0xff]   ;;  %v1942_v56 = vld [vmem:[%s2602_s0 + $0xc] ss:$16 sps:$4 sm:$0xff]  }
  0x1a   :  { %v1935_v46 = vld [vmem:[%s2602_s0] ss:$16 sps:$4 sm:$0xff]   ;;  %v1943_v58 = vld [vmem:[%s2602_s0 + $0x2c] ss:$16 sps:$4 sm:$0xff]   ;;  %v2336_v63 = vrot.slane %v1942_v56, %v2066_v20 }
  0x1b   :  { %1065 = vmatpush1.bf16.msra.mxu0 %v1750_v18  ;;  %1016 = vmatpush1.bf16.msra.mxu1 %v1859_v3  ;;  %v1789_v18 = vld [vmem:[%s2601_s1 + $0x210] ss:$8 sps:$4 sm:$0xff]   ;;  %v71_v53 = vrot.slane %v1935_v46, %v2066_v20  ;;  %v1944_v59 = vld [vmem:[%s2602_s0 + $0x4c] ss:$16 sps:$4 sm:$0xff]   ;;  %v2342_v2 = vrot.slane %v1943_v58, %v2066_v20  ;;  %v1896_v58 = vld [vmem:[%s2601_s1 + $0x380] ss:$8 sps:$4 sm:$0xff]  }
  0x1c   :  { %1066 = vmatprep.subr.bf16.mxu0 %v1751_v19  ;;  %1017 = vmatprep.subr.bf16.mxu1 %v1863_v9  ;;  %v1875_v19 = vld [vmem:[%s2601_s1 + $0x64] ss:$8 sps:$4 sm:$0xff]   ;;  %v1937_v48 = vld [vmem:[%s2602_s0 + $0x40] ss:$16 sps:$4 sm:$0xff]   ;;  %v2345_v3 = vrot.slane %v1944_v59, %v2066_v20  ;;  %v1904_v59 = vld [vmem:[%s2601_s1 + $0x394] ss:$8 sps:$4 sm:$0xff]  }
  0x1d   :  { %v1938_v50 = vld [vmem:[%s2602_s0 + $0x60] ss:$16 sps:$4 sm:$0xff]   ;;  %v143_v55 = vrot.slane %v1937_v48, %v2066_v20  ;;  %v1945_v60 = vld [vmem:[%s2602_s0 + $0x6c] ss:$16 sps:$4 sm:$0xff]  }
  0x1e   :  { %v157_v57 = vrot.slane %v1938_v50, %v2066_v20  ;;  %v1813_v0 = vld [vmem:[%s2601_s1 + $0x290] ss:$8 sps:$4 sm:$0xff]   ;;  %v1818_v9 = vld [vmem:[%s2601_s1 + $0x2a4] ss:$8 sps:$4 sm:$0xff]   ;;  %v1872_v50 = vld [vmem:[%s2601_s1 + $0x340] ss:$8 sps:$4 sm:$0xff]  }
  0x1f   :  { %1067 = vmatpush1.bf16.msra.mxu0 %v1753_v28  ;;  %1018 = vmatpush1.bf16.msra.mxu1 %v1865_v11  ;;  %v1887_v28 = vld [vmem:[%s2601_s1 + $0x84] ss:$8 sps:$4 sm:$0xff]   ;;  %v1866_v48 = vld [vmem:[%s2601_s1 + $0x330] ss:$8 sps:$4 sm:$0xff]  }
  0x20   :  { %1068 = vmatprep.subr.bf16.mxu0 %v1754_v30  ;;  %1019 = vmatprep.subr.bf16.mxu1 %v1869_v16  ;;  %v1889_v30 = vld [vmem:[%s2601_s1 + $0x80] ss:$8 sps:$4 sm:$0xff]   ;;  %v166_v1 = vcombine.high %v143_v55, %v157_v57  ;;  %v1929_v16 = vld [vmem:[%s2601_s1 + $0xf4] ss:$8 sps:$4 sm:$0xff]   ;;  %v1862_v46 = vld [vmem:[%s2601_s1 + $0x324] ss:$8 sps:$4 sm:$0xff]  }
  0x21   :  { %v1890_v56 = vld [vmem:[%s2601_s1 + $0x370] ss:$8 sps:$4 sm:$0xff]  }
  0x23   :  { %1069 = vmatpush1.bf16.msra.mxu0 %v1756_v33  ;;  %1020 = vmatpush1.bf16.msra.mxu1 %v1871_v17  ;;  %v1803_v33 = vld [vmem:[%s2601_s1 + $0x254] ss:$8 sps:$4 sm:$0xff]   ;;  %v1931_v17 = vld [vmem:[%s2601_s1 + $0xf0] ss:$8 sps:$4 sm:$0xff]  }
  0x24   :  { %1070 = vmatprep.subr.bf16.mxu0 %v1757_v35  ;;  %1021 = vmatprep.subr.bf16.mxu1 %v1875_v19  ;;  %v1801_v35 = vld [vmem:[%s2601_s1 + $0x250] ss:$8 sps:$4 sm:$0xff]  }
  0x27   :  { %1071 = vmatpush1.bf16.msra.mxu0 %v1759_v36  ;;  %1022 = vmatpush1.bf16.msra.mxu1 %v1877_v22  ;;  %v1899_v36 = vld [vmem:[%s2601_s1 + $0xa4] ss:$8 sps:$4 sm:$0xff]  }
  0x28   :  { %1072 = vmatprep.subr.bf16.mxu0 %v1760_v37  ;;  %1023 = vmatprep.subr.bf16.mxu1 %v1881_v24  ;;  %v1806_v37 = vld [vmem:[%s2601_s1 + $0x264] ss:$8 sps:$4 sm:$0xff]  }
  0x29   :  { %v1946_v22 = vld [vmem:[%s2603_s3 + $0x40] sm:$0xff]  }
  0x2b   :  { %1073 = vmatpush1.bf16.msra.mxu0 %v1762_v38  ;;  %1024 = vmatpush1.bf16.msra.mxu1 %v1883_v26  ;;  %v1901_v38 = vld [vmem:[%s2601_s1 + $0xa0] ss:$8 sps:$4 sm:$0xff]  }
  0x2c   :  { %1074 = vmatprep.subr.bf16.mxu0 %v1763_v39  ;;  %1025 = vmatprep.subr.bf16.mxu1 %v1887_v28  ;;  %v1804_v39 = vld [vmem:[%s2601_s1 + $0x260] ss:$8 sps:$4 sm:$0xff]   ;;  %v1827_v28 = vld [vmem:[%s2601_s1 + $0x2d4] ss:$8 sps:$4 sm:$0xff]  }
  0x2d   :  { %v1822_v26 = vld [vmem:[%s2601_s1 + $0x2c0] ss:$8 sps:$4 sm:$0xff]  }
  0x2f   :  { %1075 = vmatpush1.bf16.msra.mxu0 %v1765_v40  ;;  %1026 = vmatpush1.bf16.msra.mxu1 %v1889_v30  ;;  %v1905_v40 = vld [vmem:[%s2601_s1 + $0xb4] ss:$8 sps:$4 sm:$0xff]   ;;  %v1825_v30 = vld [vmem:[%s2601_s1 + $0x2d0] ss:$8 sps:$4 sm:$0xff]  }
  0x30   :  { %1076 = vmatprep.subr.bf16.mxu0 %v1766_v41  ;;  %1027 = vmatprep.subr.bf16.mxu1 %v1893_v32  ;;  %v1809_v41 = vld [vmem:[%s2601_s1 + $0x274] ss:$8 sps:$4 sm:$0xff]   ;;  %v1830_v32 = vld [vmem:[%s2601_s1 + $0x2e4] ss:$8 sps:$4 sm:$0xff]  }
  0x33   :  { %1077 = vmatpush1.bf16.msra.mxu0 %v1768_v44  ;;  %1028 = vmatpush1.bf16.msra.mxu1 %v1895_v34  ;;  %v1812_v44 = vld [vmem:[%s2601_s1 + $0x284] ss:$8 sps:$4 sm:$0xff]   ;;  %v1828_v34 = vld [vmem:[%s2601_s1 + $0x2e0] ss:$8 sps:$4 sm:$0xff]  }
  0x34   :  { %1078 = vmatprep.subr.bf16.mxu0 %v1769_v45  ;;  %1029 = vmatprep.subr.bf16.mxu1 %v1899_v36  ;;  %v1911_v45 = vld [vmem:[%s2601_s1 + $0xc4] ss:$8 sps:$4 sm:$0xff]   ;;  %v1836_v36 = vld [vmem:[%s2601_s1 + $0x2f4] ss:$8 sps:$4 sm:$0xff]  }
  0x37   :  { %1079 = vmatpush1.bf16.msra.mxu0 %v1771_v47  ;;  %1030 = vmatpush1.bf16.msra.mxu1 %v1901_v38  ;;  %v1936_v47 = vld [vmem:[%s2602_s0 + $0x20] ss:$16 sps:$4 sm:$0xff]  }
  0x38   :  { %1080 = vmatprep.subr.bf16.mxu0 %v1772_v49  ;;  %1031 = vmatprep.subr.bf16.mxu1 %v1905_v40  ;;  %v1810_v49 = vld [vmem:[%s2601_s1 + $0x280] ss:$8 sps:$4 sm:$0xff]   ;;  %v1834_v38 = vld [vmem:[%s2601_s1 + $0x2f0] ss:$8 sps:$4 sm:$0xff]  }
  0x3b   :  { %1081 = vmatpush1.bf16.msra.mxu0 %v1774_v54  ;;  %1032 = vmatpush1.bf16.msra.mxu1 %v1907_v43  ;;  %v85_v54 = vrot.slane %v1936_v47, %v2066_v20  ;;  %v1860_v47 = vld [vmem:[%s2601_s1 + $0x320] ss:$8 sps:$4 sm:$0xff]  }
  0x3c   :  { %1082 = vmatprep.subr.bf16.mxu0 %v1775_v61  ;;  %1033 = vmatprep.subr.bf16.mxu1 %v1911_v45  ;;  %v1815_v61 = vld [vmem:[%s2601_s1 + $0x294] ss:$8 sps:$4 sm:$0xff]   ;;  %v1854_v45 = vld [vmem:[%s2601_s1 + $0x310] ss:$8 sps:$4 sm:$0xff]  }
  0x3d   :  { %v94_v62 = vcombine.high %v71_v53, %v85_v54  ;;  %v93_v19 = vcombine.low %v71_v53, %v85_v54  ;;  %v1886_v53 = vld [vmem:[%s2601_s1 + $0x364] ss:$8 sps:$4 sm:$0xff]   ;;  %v1884_v54 = vld [vmem:[%s2601_s1 + $0x360] ss:$8 sps:$4 sm:$0xff]  }
  0x3f   :  { %1083 = vmatpush1.bf16.msra.mxu0 %v1777_v4  ;;  %1034 = vmatpush1.bf16.msra.mxu1 %v1913_v51  ;;  %v1919_v4 = vld [vmem:[%s2601_s1 + $0xd0] ss:$8 sps:$4 sm:$0xff]   ;;  %v222_v7 = vpack.c.bf16 %v166_v1, %v94_v62  ;;  %v1880_v51 = vld [vmem:[%s2601_s1 + $0x354] ss:$8 sps:$4 sm:$0xff]   ;;  %v1908_v62 = vld [vmem:[%s2601_s1 + $0x3a0] ss:$8 sps:$4 sm:$0xff]  }
  0x40   :  { %1095 = vmatprep.subr.bf16.mxu0 %v1788_v5  ;;  %v2351_v5 = vrot.slane %v1945_v60, %v2066_v20  ;;  %1035 = vmatprep.subr.bf16.mxu1 %v1917_v52  ;;  %v1816_v20 = vld [vmem:[%s2601_s1 + $0x2a0] ss:$8 sps:$4 sm:$0xff]   ;;  %v1878_v52 = vld [vmem:[%s2601_s1 + $0x350] ss:$8 sps:$4 sm:$0xff]   ;;  %v1922_v1 = vld [vmem:[%s2601_s1 + $0x3c4] ss:$8 sps:$4 sm:$0xff]  }
  0x41   :  { %1041 = vmatprep.mubr.bf16.mxu1 %v222_v7  ;;  %v1902_v60 = vld [vmem:[%s2601_s1 + $0x390] ss:$8 sps:$4 sm:$0xff]   ;;  %v1941_v7 = vld [vmem:[%s2601_s1 + $0x3f4] ss:$8 sps:$4 sm:$0xff]  }
  0x42   :  { %1085 = vmatmul.mubr.bf16.vlgmr.msra.gmra.mrb[0].mxu0 %v223_v10  ;;  %v131_v10 = vcombine.low %v2336_v63, %v2342_v2  ;;  %v203_v11 = vcombine.low %v2345_v3, %v2351_v5  ;;  %v204_v40 = vcombine.high %v2345_v3, %v2351_v5  ;;  %v1928_v3 = vld [vmem:[%s2601_s1 + $0x3d4] ss:$8 sps:$4 sm:$0xff]   ;;  %v1934_v5 = vld [vmem:[%s2601_s1 + $0x3e4] ss:$8 sps:$4 sm:$0xff]  }
  0x43   :  { %1096 = vmatpush1.bf16.msra.mxu0 %v1786_v12  ;;  %1127 = vmatprep.mubr.bf16.mxu0 %v226_v14  ;;  %v1821_v12 = vld [vmem:[%s2601_s1 + $0x2b4] ss:$8 sps:$4 sm:$0xff]  }
  0x44   :  { %1097 = vmatprep.subr.bf16.mxu0 %v1791_v13  ;;  %1036 = vmatpush1.bf16.msra.mxu1 %v1919_v4  ;;  %v1925_v13 = vld [vmem:[%s2601_s1 + $0xe0] ss:$8 sps:$4 sm:$0xff]   ;;  %v2372_v14 = vpack.c.bf16 %v203_v11, %v131_v10  ;;  %v1926_v4 = vld [vmem:[%s2601_s1 + $0x3d0] ss:$8 sps:$4 sm:$0xff]  }
  0x45   :  { %1037 = vmatprep.subr.bf16.mxu1 %v1923_v6  ;;  %v1932_v6 = vld [vmem:[%s2601_s1 + $0x3e0] ss:$8 sps:$4 sm:$0xff]  }
  0x46   :  { %v1954_v10 = vld [vmem:[%s2603_s3 + $0x60] sm:$0xff]  }
  0x47   :  { %1098 = vmatpush1.bf16.msra.mxu0 %v1789_v18  ;;  %v1819_v18 = vld [vmem:[%s2601_s1 + $0x2b0] ss:$8 sps:$4 sm:$0xff]   ;;  %v1955_v11 = vld [vmem:[%s2603_s3 + $0x20] sm:$0xff]  }
  0x48   :  { %1099 = vmatprep.subr.bf16.mxu0 %v1794_v21  ;;  %v165_v21 = vcombine.low %v143_v55, %v157_v57  ;;  %1038 = vmatpush1.bf16.msra.mxu1 %v1925_v13  ;;  %v1892_v55 = vld [vmem:[%s2601_s1 + $0x374] ss:$8 sps:$4 sm:$0xff]   ;;  %v1898_v57 = vld [vmem:[%s2601_s1 + $0x384] ss:$8 sps:$4 sm:$0xff]  }
  0x49   :  { %1039 = vmatprep.subr.bf16.mxu1 %v1929_v16  ;;  %v1958_v13 = vld [vmem:[%s2603_s3 + $0x70] sm:$0xff]   ;;  %v1960_v16 = vld [vmem:[%s2603_s3 + $0x78] sm:$0xff]  }
  0x4a   :  { %v221_v24 = vpack.c.bf16 %v165_v21, %v93_v19 }
  0x4b   :  { %1100 = vmatpush1.bf16.msra.mxu0 %v1792_v23  ;;  %v1824_v23 = vld [vmem:[%s2601_s1 + $0x2c4] ss:$8 sps:$4 sm:$0xff]  }
  0x4c   :  { %1101 = vmatprep.subr.bf16.mxu0 %v1797_v25  ;;  %1040 = vmatpush1.bf16.msra.mxu1 %v1931_v17  ;;  %v1947_v25 = vld [vmem:[%s2603_s3] sm:$0xff]   ;;  %v1961_v17 = vld [vmem:[%s2603_s3 + $0x38] sm:$0xff]  }
  0x4d   :  { %1660 = vmatprep.subr.bf16.mxu1 %v1946_v22 }
  0x4f   :  { %1102 = vmatpush1.bf16.msra.mxu0 %v1795_v27  ;;  %v1948_v27 = vld [vmem:[%s2603_s3 + $0x48] sm:$0xff]   ;;  %1042 = vmatmul.mubr.bf16.vlgmr.msra.gmra.mrb[0].mxu1 %v221_v24  ;;  %v361_v24 = vsub.s32 0, %v2051_v15 }
  0x50   :  { %1103 = vmatprep.subr.bf16.mxu0 %v1800_v29  ;;  %1661 = vmatpush3.bf16.msra.mxu1 %v1947_v25  ;;  %v1949_v29 = vld [vmem:[%s2603_s3 + $0x8] sm:$0xff]   ;;  %v357_v25 = vld [vmem:[%s2605_s2] sm:$0x3] }
  0x51   :  { %1662 = vmatprep.subr.bf16.mxu1 %v1948_v27  ;;  %v362_v27 = vrot.slane %v357_v25, %v361_v24 }
  0x53   :  { %1104 = vmatpush1.bf16.msra.mxu0 %v1798_v31  ;;  %v1950_v31 = vld [vmem:[%s2603_s3 + $0x50] sm:$0xff]  }
  0x54   :  { %1105 = vmatprep.subr.bf16.mxu0 %v1803_v33  ;;  %1663 = vmatpush3.bf16.msra.mxu1 %v1949_v29  ;;  %v1951_v33 = vld [vmem:[%s2603_s3 + $0x10] sm:$0xff]  }
  0x55   :  { %1664 = vmatprep.subr.bf16.mxu1 %v1950_v31 }
  0x57   :  { %1106 = vmatpush1.bf16.msra.mxu0 %v1801_v35  ;;  %v1952_v35 = vld [vmem:[%s2603_s3 + $0x58] sm:$0xff]  }
  0x58   :  { %1107 = vmatprep.subr.bf16.mxu0 %v1806_v37  ;;  %1665 = vmatpush3.bf16.msra.mxu1 %v1951_v33  ;;  %v1953_v37 = vld [vmem:[%s2603_s3 + $0x18] sm:$0xff]  }
  0x59   :  { %1666 = vmatprep.subr.bf16.mxu1 %v1952_v35 }
  0x5b   :  { %1108 = vmatpush1.bf16.msra.mxu0 %v1804_v39  ;;  %v132_v39 = vcombine.high %v2336_v63, %v2342_v2  ;;  %v1916_v63 = vld [vmem:[%s2601_s1 + $0x3b4] ss:$8 sps:$4 sm:$0xff]   ;;  %v1920_v2 = vld [vmem:[%s2601_s1 + $0x3c0] ss:$8 sps:$4 sm:$0xff]  }
  0x5c   :  { %1109 = vmatprep.subr.bf16.mxu0 %v1809_v41  ;;  %v1850_v41 = vld [vmem:[%s2601_s1 + $0x304] ss:$8 sps:$4 sm:$0xff]   ;;  %1667 = vmatpush3.bf16.msra.mxu1 %v1953_v37 }
  0x5d   :  { %v228_v43 = vpack.c.bf16 %v204_v40, %v132_v39  ;;  %1668 = vmatprep.subr.bf16.mxu1 %v1954_v10 }
  0x5f   :  { %1110 = vmatpush1.bf16.msra.mxu0 %v1807_v42  ;;  %v1848_v42 = vld [vmem:[%s2601_s1 + $0x300] ss:$8 sps:$4 sm:$0xff]  }
  0x60   :  { %1111 = vmatprep.subr.bf16.mxu0 %v1812_v44  ;;  %v1856_v44 = vld [vmem:[%s2601_s1 + $0x314] ss:$8 sps:$4 sm:$0xff]   ;;  %1669 = vmatpush3.bf16.msra.mxu1 %v1955_v11 }
  0x63   :  { %1112 = vmatpush1.bf16.msra.mxu0 %v1810_v49  ;;  %v1874_v49 = vld [vmem:[%s2601_s1 + $0x344] ss:$8 sps:$4 sm:$0xff]  }
  0x64   :  { %1113 = vmatprep.subr.bf16.mxu0 %v1815_v61  ;;  %v1910_v61 = vld [vmem:[%s2601_s1 + $0x3a4] ss:$8 sps:$4 sm:$0xff]  }
  0x67   :  { %1114 = vmatpush1.bf16.msra.mxu0 %v1813_v0  ;;  %v1914_v0 = vld [vmem:[%s2601_s1 + $0x3b0] ss:$8 sps:$4 sm:$0xff]  }
  0x68   :  { %1115 = vmatprep.subr.bf16.mxu0 %v1818_v9  ;;  %v1939_v9 = vld [vmem:[%s2601_s1 + $0x3f0] ss:$8 sps:$4 sm:$0xff]  }
  0x6b   :  { %1116 = vmatpush1.bf16.msra.mxu0 %v1816_v20  ;;  %v1956_v20 = vld [vmem:[%s2603_s3 + $0x68] sm:$0xff]  }
  0x6c   :  { %1117 = vmatprep.subr.bf16.mxu0 %v1821_v12  ;;  %1670 = vmatprep.subr.bf16.mxu1 %v1956_v20  ;;  %v1957_v12 = vld [vmem:[%s2603_s3 + $0x28] sm:$0xff]  }
  0x6d   :  { %1671 = vmatpush3.bf16.msra.mxu1 %v1957_v12 }
  0x6e   :  { %1672 = vmatprep.subr.bf16.mxu1 %v1958_v13 }
  0x6f   :  { %1118 = vmatpush1.bf16.msra.mxu0 %v1819_v18  ;;  %v1971_v18 = vmov 0.0  }
  0x70   :  { %1119 = vmatprep.subr.bf16.mxu0 %v1824_v23 }
  0x73   :  { %1120 = vmatpush1.bf16.msra.mxu0 %v1822_v26  ;;  %v365_v26 = vsub.s32 1, %v2051_v15 }
  0x74   :  { %1121 = vmatprep.subr.bf16.mxu0 %v1827_v28 }
  0x75   :  { %v366_v28 = vrot.slane %v357_v25, %v365_v26 }
  0x77   :  { %1122 = vmatpush1.bf16.msra.mxu0 %v1825_v30 }
  0x78   :  { %1123 = vmatprep.subr.bf16.mxu0 %v1830_v32 }
  0x7b   :  { %1124 = vmatpush1.bf16.msra.mxu0 %v1828_v34 }
  0x7c   :  { %1125 = vmatprep.subr.bf16.mxu0 %v1836_v36 }
  0x7f   :  { %1126 = vmatpush1.bf16.msra.mxu0 %v1834_v38 }
  0x80   :  { %1138 = vmatprep.subr.bf16.mxu0 %v1850_v41 }
  0x82   :  { %1128 = vmatmul.mubr.bf16.vlgmr.msra.gmra.mrb[0].mxu0 %v2194_v8  ;;  %v1868_v8 = vld [vmem:[%s2601_s1 + $0x334] ss:$8 sps:$4 sm:$0xff]  }
  0x83   :  { %1139 = vmatpush1.bf16.msra.mxu0 %v1848_v42  ;;  %1170 = vmatprep.mubr.bf16.mxu0 %v228_v43 }
  0x84   :  { %1140 = vmatprep.subr.bf16.mxu0 %v1856_v44 }
  0x87   :  { %1141 = vmatpush1.bf16.msra.mxu0 %v1854_v45 }
  0x88   :  { %1142 = vmatprep.subr.bf16.mxu0 %v1862_v46  ;;  %v1962_v46 = vld [vmem:[%s2604_s5] sm:$0xff]  }
  0x8b   :  { %1143 = vmatpush1.bf16.msra.mxu0 %v1860_v47  ;;  %v1963_v47 = vld [vmem:[%s2604_s5 + $0x8] sm:$0xff]  }
  0x8c   :  { %1144 = vmatprep.subr.bf16.mxu0 %v1868_v8  ;;  %v1964_v8 = vld [vmem:[%s2604_s5 + $0x10] sm:$0xff]  }
  0x8f   :  { %1145 = vmatpush1.bf16.msra.mxu0 %v1866_v48  ;;  %v1965_v48 = vld [vmem:[%s2604_s5 + $0x18] sm:$0xff]  }
  0x90   :  { %1146 = vmatprep.subr.bf16.mxu0 %v1874_v49  ;;  %v1966_v49 = vld [vmem:[%s2604_s5 + $0x20] sm:$0xff]  }
  0x93   :  { %1147 = vmatpush1.bf16.msra.mxu0 %v1872_v50  ;;  %v1967_v50 = vld [vmem:[%s2604_s5 + $0x28] sm:$0xff]  }
  0x94   :  { %1148 = vmatprep.subr.bf16.mxu0 %v1880_v51  ;;  %v1968_v51 = vld [vmem:[%s2604_s5 + $0x30] sm:$0xff]  }
  0x97   :  { %1149 = vmatpush1.bf16.msra.mxu0 %v1878_v52  ;;  %v1969_v52 = vld [vmem:[%s2604_s5 + $0x38] sm:$0xff]  }
  0x98   :  { %1150 = vmatprep.subr.bf16.mxu0 %v1886_v53 }
  0x9b   :  { %1151 = vmatpush1.bf16.msra.mxu0 %v1884_v54  ;;  %v1625_v54 = vld [vmem:[%s2606_s4] ss:$0 sm:$0xff] }
  0x9c   :  { %1152 = vmatprep.subr.bf16.mxu0 %v1892_v55 }
  0x9f   :  { %1153 = vmatpush1.bf16.msra.mxu0 %v1890_v56 }
  0xa0   :  { %1154 = vmatprep.subr.bf16.mxu0 %v1898_v57 }
  0xa3   :  { %1155 = vmatpush1.bf16.msra.mxu0 %v1896_v58 }
  0xa4   :  { %1156 = vmatprep.subr.bf16.mxu0 %v1904_v59 }
  0xa7   :  { %1157 = vmatpush1.bf16.msra.mxu0 %v1902_v60 }
  0xa8   :  { %1158 = vmatprep.subr.bf16.mxu0 %v1910_v61 }
  0xab   :  { %1159 = vmatpush1.bf16.msra.mxu0 %v1908_v62 }
  0xac   :  { %1160 = vmatprep.subr.bf16.mxu0 %v1916_v63 }
  0xaf   :  { %1161 = vmatpush1.bf16.msra.mxu0 %v1914_v0 }
  0xb0   :  { %1162 = vmatprep.subr.bf16.mxu0 %v1922_v1  ;;  %v1642_v1 = vld [vmem:[%s2608_s6] ss:$0 sm:$0xff] }
  0xb3   :  { %1163 = vmatpush1.bf16.msra.mxu0 %v1920_v2 }
  0xb4   :  { %1164 = vmatprep.subr.bf16.mxu0 %v1928_v3 }
  0xb7   :  { %1165 = vmatpush1.bf16.msra.mxu0 %v1926_v4 }
  0xb8   :  { %1166 = vmatprep.subr.bf16.mxu0 %v1934_v5 }
  0xbb   :  { %1167 = vmatpush1.bf16.msra.mxu0 %v1932_v6 }
  0xbc   :  { %1168 = vmatprep.subr.bf16.mxu0 %v1941_v7 }
  0xbf   :  { %1169 = vmatpush1.bf16.msra.mxu0 %v1939_v9 }
  0xc2   :  { %1171 = vmatmul.mubr.bf16.vlgmr.msra.gmra.mrb[0].mxu0 %v2372_v14  ;;  %v1959_v14 = vld [vmem:[%s2603_s3 + $0x30] sm:$0xff]  }
  0xc3   :  { %1673 = vmatpush3.bf16.msra.mxu1 %v1959_v14 }
  0xc4   :  { %1674 = vmatprep.subr.bf16.mxu1 %v1960_v16 }
  0xc7   :  { %1675 = vmatpush3.bf16.msra.mxu1 %v1961_v17 }
  0xc8   :  { %1691 = vmatprep.subr.bf16.mxu1 %v1971_v18 }
 0x122   :  { %v1043_v19 = vpop.f32.mrb[0].mxu1 }
 0x123   :  { %v1045_v21 = vpop.f32.mrb[1].mxu1  ;;  %v1044_v29 = vadd.f32 %v1043_v19, %v362_v27 }
 0x124   :  { %v1047_v22 = vpop.f32.mrb[2].mxu1  ;;  %v1046_v30 = vadd.f32 %v1045_v21, %v366_v28 }
 0x125   :  { %v1049_v23 = vpop.f32.mrb[3].mxu1  ;;  %v1048_v32 = vadd.f32 %v1047_v22, %v362_v27 }
 0x126   :  { %v1050_v35 = vadd.f32 %v1049_v23, %v366_v28 }
 0x195   :  { %v1172_v31 = vpop.f32.mrb[0].mxu0 }
 0x196   :  { %v1712_v33 = vadd.f32 %v1172_v31, %v1044_v29  ;;  %v1174_v34 = vpop.f32.mrb[1].mxu0 }
 0x197   :  { %v1714_v36 = vadd.f32 %v1174_v34, %v1046_v30  ;;  %v1176_v37 = vpop.f32.mrb[2].mxu0 }
 0x198   :  { %v1716_v38 = vadd.f32 %v1176_v37, %v1048_v32  ;;  %v1178_v39 = vpop.f32.mrb[3].mxu0  ;;  %v1181_v41 = vmax.f32 %v1712_v33, 0.0 }
 0x199   :  { %v1718_v40 = vadd.f32 %v1178_v39, %v1050_v35  ;;  %v1182_v43 = vmax.f32 %v1714_v36, 0.0 }
 0x19a   :  { %v1183_v42 = vmax.f32 %v1716_v38, 0.0 }
 0x19b   :  { %v1184_v44 = vmax.f32 %v1718_v40, 0.0 }
 0x19c   :  { %v1185_v45 = vpack.c.bf16 %v1183_v42, %v1181_v41 }
 0x19d   :  { %v1186_v15 = vpack.c.bf16 %v1184_v44, %v1182_v43 }
 0x19f   :  { %1354 = vmatprep.mubr.bf16.mxu1 %v1186_v15 }
 0x1a0   :  { %1355 = vmatmul.mubr.bf16.vlgmr.msra.gmra.mrb[4].mxu1 %v1185_v45 }
 0x1a1   :  { %1692 = vmatpush3.bf16.msra.mxu1 %v1962_v46  ;;  %1707 = vmatprep.mubr.msk.bf16.mxu1 %vm1972_vm0, %v1971_v18 }
 0x1a2   :  { %1693 = vmatprep.subr.bf16.mxu1 %v1971_v18 }
 0x1a5   :  { %1694 = vmatpush3.bf16.msra.mxu1 %v1963_v47 }
 0x1a6   :  { %1695 = vmatprep.subr.bf16.mxu1 %v1971_v18 }
 0x1a9   :  { %1696 = vmatpush3.bf16.msra.mxu1 %v1964_v8 }
 0x1aa   :  { %1697 = vmatprep.subr.bf16.mxu1 %v1971_v18 }
 0x1ad   :  { %1698 = vmatpush3.bf16.msra.mxu1 %v1965_v48 }
 0x1ae   :  { %1699 = vmatprep.subr.bf16.mxu1 %v1971_v18 }
 0x1b1   :  { %1700 = vmatpush3.bf16.msra.mxu1 %v1966_v49 }
 0x1b2   :  { %1701 = vmatprep.subr.bf16.mxu1 %v1971_v18 }
 0x1b5   :  { %1702 = vmatpush3.bf16.msra.mxu1 %v1967_v50 }
 0x1b6   :  { %1703 = vmatprep.subr.bf16.mxu1 %v1971_v18 }
 0x1b9   :  { %1704 = vmatpush3.bf16.msra.mxu1 %v1968_v51 }
 0x1ba   :  { %1705 = vmatprep.subr.bf16.mxu1 %v1971_v18 }
 0x1bd   :  { %1706 = vmatpush3.bf16.msra.mxu1 %v1969_v52 }
 0x273   :  { %v1676_v53 = vpop.f32.mrb[4].mxu1 }
 0x274   :  { %v1677_v55 = vpop.f32.mrb[5].mxu1 }
 0x275   :  { %v1678_v56 = vadd.f32 %v1677_v55, %v1676_v53  ;;  %v1679_v57 = vpop.f32.mrb[6].mxu1 }
 0x276   :  { %v1680_v58 = vpop.f32.mrb[7].mxu1 }
 0x277   :  { %v1357_v59 = vadd.f32 %v1678_v56, %v1625_v54  ;;  %v1681_v60 = vadd.f32 %v1680_v58, %v1679_v57 }
 0x279   :  { %v1360_v61 = vadd.f32 %v1681_v60, %v1625_v54  ;;  %v1363_v62 = vmax.f32 %v1357_v59, 0.0 }
 0x27b   :  { %v1364_v63 = vmax.f32 %v1360_v61, 0.0 }
 0x27d   :  { %v1365_v0 = vpack.c.bf16 %v1364_v63, %v1363_v62 }
 0x27f   :  { %1659 = vst [vmem:[%s2607_s8] sm:$0xff] %v1365_v0   ;;  %1708 = vmatmul.mubr.bf16.vlgmr.msra.gmra.mrb[8].mxu1 %v1365_v0 }
 0x352   :  { %v1471_v2 = vpop.f32.mrb[8].mxu1 }
 0x353   :  { %v1472_v3 = vadd.f32 %v1642_v1, %v1471_v2  ;;  %v1709_v4 = vpop.f32.mrb[9].mxu1 }
 0x354   :  { %v1474_v5 = vpop.f32.mrb[10].mxu1 }
 0x355   :  { %1478 = vst [vmem:[%s2609_s7] sm:$0xff] %v1472_v3  ;;  %v1475_v6 = vadd.f32 %v1642_v1, %v1474_v5  ;;  %v1710_v7 = vpop.f32.mrb[11].mxu1 }
 0x357   :  { %1479 = vst [vmem:[%s2609_s7 + $0x8] sm:$0xff] %v1475_v6 }

</bundles_post_ra>
